<compile_context>
chip_gen: v6e
topology: v6e:2x2x1
jax: 0.10.0
libtpu: 0.0.40
codegen_flags: <defaults>
</compile_context>

<pallas_src>
import jax
import jax.numpy as jnp
from jax import lax
from jax.experimental import pallas as pl
from jax.experimental.pallas import tpu as pltpu


def _round_up(v, m):
    return ((v + m - 1) // m) * m


def _make_kernel(n_models, n_classes_pad, tm):
    """Per-M-tile kernel. N, Cp, tm are compile-time constants."""
    N, Cp = n_models, n_classes_pad

    def kernel(x_ref, tgt_ref, mask_ref, w_ref, b_ref, stats_ref):
        """
        x_ref     : [tm, Dp]    bf16  frame-feature tile (D zero-padded)
        tgt_ref   : [tm, 1]     i32   target class ids (shared across probes)
        mask_ref  : [tm, 1]     f32   valid-frame mask (0/1)
        w_ref     : [Dp, N*Cp]  bf16  all probe weights, packed lane-dense
        b_ref     : [1, N*Cp]   f32   all probe biases (-1e9 on padded lanes)
        stats_ref : [8, 128]    f32   resident accumulator for this M-group:
                                      row 0, lane n -> sum(mask * nll_n)
                                      row 1, lane n -> sum(mask * correct_n)
        """
        i = pl.program_id(1)

        @pl.when(i == 0)
        def _init():
            stats_ref[...] = jnp.zeros_like(stats_ref)

        # One fused, lane-dense MXU matmul for all N probes (bf16 in, f32 acc).
        logits = jnp.dot(x_ref[...], w_ref[...],
                         preferred_element_type=jnp.float32) + b_ref[...]  # [tm, N*Cp]
        tgt = tgt_ref[...]                                                 # [tm, 1] i32
        tgt_f = tgt.astype(jnp.float32)
        mask = mask_ref[...]                                               # [tm, 1] f32

        # Shared across probes: one-hot of the target over one probe's Cp lanes.
        class_ids = lax.broadcasted_iota(jnp.int32, (tm, Cp), 1)
        class_ids_f = class_ids.astype(jnp.float32)
        onehot = (class_ids == tgt).astype(jnp.float32)                    # [tm, Cp]

        loss_cols = []
        corr_cols = []
        # Static unroll over the (small) number of probes; every slice is a
        # 128-lane-aligned vreg-column slice of the fused logits.
        for n in range(N):
            sl = logits[:, n * Cp:(n + 1) * Cp]                            # [tm, Cp]
            rmax = jnp.max(sl, axis=-1, keepdims=True)                     # [tm, 1]
            lse = jnp.log(jnp.sum(jnp.exp(sl - rmax), axis=-1, keepdims=True))
            tlog = jnp.sum(onehot * sl, axis=-1, keepdims=True)            # [tm, 1]
            # Stable CE without materializing the full log-prob tensor.
            nll = rmax + lse - tlog                                        # [tm, 1]
            # Exact argmax semantics (first max index wins ties).
            pred = jnp.min(jnp.where(sl == rmax, class_ids_f, jnp.float32(1e9)),
                           axis=-1, keepdims=True)                         # [tm, 1]
            corr = (pred == tgt_f).astype(jnp.float32)                     # [tm, 1]
            loss_cols.append(jnp.sum(nll * mask, axis=0, keepdims=True))   # [1, 1]
            corr_cols.append(jnp.sum(corr * mask, axis=0, keepdims=True))  # [1, 1]

        loss_row = jnp.concatenate(loss_cols, axis=1)                      # [1, N]
        corr_row = jnp.concatenate(corr_cols, axis=1)                      # [1, N]
        stats_ref[0:1, 0:N] += loss_row
        stats_ref[1:2, 0:N] += corr_row

    return kernel


def linear_probe_forward(x, targets, valid_frame_mask, weights, biases, *, tm=512):
    """Run all N linear probes with one pallas_call, grid over (group, M tile).

    x:       [M, D]    f32   flattened frames (B*T) x features (rvq_centroid dim)
    targets: [M, 1]    i32   target class ids
    mask:    [M, 1]    f32   valid-frame mask
    weights: [N, D, C] f32   per-probe Linear weights
    biases:  [N, 1, C] f32   per-probe Linear biases
    returns: (losses [N], accs [N]) per-probe masked mean CE loss / accuracy.
    """
    M, D = x.shape
    N, D2, C = weights.shape
    assert D2 == D
    assert N <= 128, "more than 128 probes would need extra accumulator rows"

    Cp = _round_up(C, 128)        # lane-dense per-probe class block
    Dp = _round_up(D, 128)        # full-width MXU contraction
    NCp = N * Cp

    # Pack all probe weights lane-dense [Dp, N*Cp].  Padded class lanes get zero
    # weight and a -1e9 bias (never win the max, exp() underflows to 0).
    w_all = jnp.zeros((D, N, Cp), jnp.float32)
    w_all = w_all.at[:, :, :C].set(jnp.transpose(weights, (1, 0, 2)))
    w_all = w_all.reshape(D, NCp)
    if Dp != D:
        w_all = jnp.pad(w_all, ((0, Dp - D), (0, 0)))      # zero-pad K: exact
    w_all = w_all.astype(jnp.bfloat16)

    b_all = jnp.full((N, Cp), -1e9, dtype=jnp.float32)
    b_all = b_all.at[:, :C].set(biases.reshape(N, C))
    b_all = b_all.reshape(1, NCp)

    x_p = x.astype(jnp.bfloat16)
    if Dp != D:
        x_p = jnp.pad(x_p, ((0, 0), (0, Dp - D)))
    tgt = targets.astype(jnp.int32)
    mask = valid_frame_mask.astype(jnp.float32)

    # M tiling.  Leading "parallel" axis over tile groups lets v7x's two
    # TensorCores each own an (8,128) accumulator block; padded rows are
    # masked out so they contribute nothing.
    tm_eff = max(8, _round_up(min(tm, M), 8))
    tiles = pl.cdiv(M, tm_eff)
    groups = 2 if tiles >= 2 else 1
    tpg = pl.cdiv(tiles, groups)
    m_pad = groups * tpg * tm_eff
    if m_pad != M:
        pad = m_pad - M
        x_p = jnp.pad(x_p, ((0, pad), (0, 0)))
        tgt = jnp.pad(tgt, ((0, pad), (0, 0)))
        mask = jnp.pad(mask, ((0, pad), (0, 0)))

    kernel = _make_kernel(N, Cp, tm_eff)

    stats = pl.pallas_call(
        kernel,
        grid=(groups, tpg),
        in_specs=[
            pl.BlockSpec((tm_eff, Dp), lambda g, i: (g * tpg + i, 0)),  # x tile
            pl.BlockSpec((tm_eff, 1), lambda g, i: (g * tpg + i, 0)),   # targets
            pl.BlockSpec((tm_eff, 1), lambda g, i: (g * tpg + i, 0)),   # mask
            pl.BlockSpec((Dp, NCp), lambda g, i: (0, 0)),               # weights (resident)
            pl.BlockSpec((1, NCp), lambda g, i: (0, 0)),                # biases (resident)
        ],
        out_specs=pl.BlockSpec((8, 128), lambda g, i: (g, 0)),          # per-group stats
        out_shape=jax.ShapeDtypeStruct((8 * groups, 128), jnp.float32),
        compiler_params=pltpu.CompilerParams(
            # Group axis independent -> parallel (megacore); M-tile axis carries
            # the resident accumulator -> arbitrary.
            dimension_semantics=("parallel", "arbitrary"),
            vmem_limit_bytes=32 * 1024 * 1024,
        ),
    )(x_p, tgt, mask, w_all, b_all)

    # Finalize on the host side of the call: sum the per-group blocks and divide
    # by the masked-frame count (padded rows have mask == 0).
    stats = stats.reshape(groups, 8, 128).sum(axis=0)
    denom = jnp.maximum(jnp.sum(valid_frame_mask.astype(jnp.float32)), 1e-6)
    inv = 1.0 / denom
    losses = stats[0, :N] * inv
    accs = stats[1, :N] * inv
    return losses, accs


def base_task_forward_helper(x, targets, valid_frame_mask, weights, biases,
                             name="probe", semantic_field="accuracy+",
                             run_on_codebooks=True):
    """Mirror of BaseTask.forward_helper: accumulate loss / semantic_error and
    build the metrics dict.  Heavy math lives in the Pallas kernel."""
    losses, accs = linear_probe_forward(x, targets, valid_frame_mask, weights, biases)

    loss = jnp.sum(losses)
    sign = 1.0 if semantic_field[-1] == "+" else -1.0
    semantic_error = sign * jnp.sum(accs)

    metrics = {}
    field = semantic_field[:-1]
    N = weights.shape[0]
    for i in range(N):
        suffix = f"_{i}" if run_on_codebooks else ""
        metrics[f"{name}_loss{suffix}"] = losses[i]
        metrics[f"{name}_{field}{suffix}"] = accs[i]
    metrics["semantic_error"] = semantic_error
    metrics[f"loss_{name}"] = loss
    return loss, metrics


def _reference(x, targets, valid_frame_mask, weights, biases):
    """Plain-JAX reference (same bf16 input quantization as the kernel)."""
    xq = x.astype(jnp.bfloat16).astype(jnp.float32)
    wq = weights.astype(jnp.bfloat16).astype(jnp.float32)
    logits = jnp.einsum("md,ndc->nmc", xq, wq) + biases                # [N, M, C]
    logp = jax.nn.log_softmax(logits, axis=-1)
    tgt = targets[:, 0]                                                # [M]
    onehot = jax.nn.one_hot(tgt, logits.shape[-1], dtype=jnp.float32)  # [M, C]
    nll = -jnp.sum(onehot[None] * logp, axis=-1)                       # [N, M]
    mask = valid_frame_mask[:, 0]                                      # [M]
    denom = jnp.maximum(jnp.sum(mask), 1e-6)
    losses = jnp.sum(nll * mask[None], axis=-1) / denom                # [N]
    preds = jnp.argmax(logits, axis=-1)                                # [N, M]
    accs = jnp.sum((preds == tgt[None]).astype(jnp.float32) * mask[None], axis=-1) / denom
    return losses, accs


def _make_inputs(key, M, D, C, N):
    k_x, k_t, k_m, k_w, k_b = jax.random.split(key, 5)
    x = jax.random.normal(k_x, (M, D), dtype=jnp.float32)
    targets = jax.random.randint(k_t, (M, 1), 0, C, dtype=jnp.int32)
    mask = (jax.random.uniform(k_m, (M, 1)) > 0.2).astype(jnp.float32)
    weights = 0.1 * jax.random.normal(k_w, (N, D, C), dtype=jnp.float32)
    biases = 0.01 * jax.random.normal(k_b, (N, 1, C), dtype=jnp.float32)
    return x, targets, mask, weights, biases


if __name__ == "__main__":
    key = jax.random.PRNGKey(0)
    k1, k2 = jax.random.split(key)

    # --- small module-sized case: batch=2, frames=8, D=32, C=16, N=4 probes ---
    B, T, D, C, N = 2, 8, 32, 16, 4
    M = B * T
    x, targets, mask, weights, biases = _make_inputs(k1, M, D, C, N)

    loss, metrics = base_task_forward_helper(x, targets, mask, weights, biases)
    loss = jax.block_until_ready(loss)
    metrics = jax.tree_util.tree_map(jax.block_until_ready, metrics)

    ref_losses, ref_accs = _reference(x, targets, mask, weights, biases)
    pl_losses, pl_accs = linear_probe_forward(x, targets, mask, weights, biases)
    pl_losses = jax.block_until_ready(pl_losses)
    assert jnp.allclose(pl_losses, ref_losses, atol=2e-3, rtol=2e-3), (pl_losses, ref_losses)
    assert jnp.allclose(pl_accs, ref_accs, atol=2e-3, rtol=2e-3), (pl_accs, ref_accs)
    assert jnp.allclose(loss, jnp.sum(ref_losses), atol=2e-3, rtol=2e-3)

    # --- multi-tile / multi-group case: exercises accumulation, padding and the
    #     leading "parallel" group axis (grid = (2, 4) at tm=128) -------------
    M2 = 1000
    x2, t2, m2, w2, b2 = _make_inputs(k2, M2, D, C, N)
    pl_l2, pl_a2 = linear_probe_forward(x2, t2, m2, w2, b2, tm=128)
    pl_l2 = jax.block_until_ready(pl_l2)
    ref_l2, ref_a2 = _reference(x2, t2, m2, w2, b2)
    assert jnp.allclose(pl_l2, ref_l2, atol=2e-3, rtol=2e-3), (pl_l2, ref_l2)
    assert jnp.allclose(pl_a2, ref_a2, atol=2e-3, rtol=2e-3), (pl_a2, ref_a2)

    print("KERNEL_OK")
</pallas_src>

<mosaic_0001>
module attributes {stable_mosaic.version = 11 : i64} {
  func.func @kernel(%arg0: i32, %arg1: i32, %arg2: memref<16x128xbf16, #tpu.memory_space<vmem>>, %arg3: memref<16x1xi32, #tpu.memory_space<vmem>>, %arg4: memref<16x1xf32, #tpu.memory_space<vmem>>, %arg5: memref<128x512xbf16, #tpu.memory_space<vmem>>, %arg6: memref<1x512xf32, #tpu.memory_space<vmem>>, %arg7: memref<8x128xf32, #tpu.memory_space<vmem>>) attributes {dimension_semantics = [#tpu.dimension_semantics<parallel>, #tpu.dimension_semantics<arbitrary>], iteration_bounds = array<i64: 1, 1>, scalar_prefetch = 0 : i64, scratch_operands = 0 : i64, tpu.core_type = #tpu.core_type<tc>, window_params = [{transform_indices = @transform_0, window_bounds = array<i64: 16, 128>}, {transform_indices = @transform_1, window_bounds = array<i64: 16, 1>}, {transform_indices = @transform_2, window_bounds = array<i64: 16, 1>}, {pipeline_mode = #tpu.pipeline_mode<synchronous>, transform_indices = @transform_3, window_bounds = array<i64: 128, 512>}, {pipeline_mode = #tpu.pipeline_mode<synchronous>, transform_indices = @transform_4, window_bounds = array<i64: 1, 512>}, {transform_indices = @transform_5, window_bounds = array<i64: 8, 128>}]} {
    %c0_i32 = arith.constant 0 : i32
    %0 = arith.cmpi eq, %arg1, %c0_i32 : i32
    %1 = arith.extui %0 : i1 to i32
    %c0_i32_0 = arith.constant 0 : i32
    %2 = arith.cmpi ne, %1, %c0_i32_0 : i32
    scf.if %2 {
      %cst_45 = arith.constant 0.000000e+00 : f32
      %142 = vector.broadcast %cst_45 : f32 to vector<8x128xf32>
      %c0_46 = arith.constant 0 : index
      %c0_47 = arith.constant 0 : index
      %143 = vector.load %arg7[%c0_46, %c0_47] : memref<8x128xf32, #tpu.memory_space<vmem>>, vector<8x128xf32>
      tpu.vector_store %arg7[%c0_46, %c0_47], %142 {strides = array<i32>} : memref<8x128xf32, #tpu.memory_space<vmem>>, vector<8x128xf32>,
    } else {
    }
    %c0 = arith.constant 0 : index
    %c0_1 = arith.constant 0 : index
    %3 = vector.load %arg2[%c0, %c0_1] : memref<16x128xbf16, #tpu.memory_space<vmem>>, vector<16x128xbf16>
    %c0_2 = arith.constant 0 : index
    %c0_3 = arith.constant 0 : index
    %4 = vector.load %arg5[%c0_2, %c0_3] : memref<128x512xbf16, #tpu.memory_space<vmem>>, vector<128x512xbf16>
    %cst = arith.constant dense<0.000000e+00> : vector<16x512xf32>
    %5 = tpu.matmul %3, %4, %cst {dimension_numbers = #tpu.dot_dimension_numbers<[1], [0], [0], [1], [0, 0, 1, 1], [], []>} : vector<16x128xbf16>, vector<128x512xbf16>, vector<16x512xf32> -> vector<16x512xf32>
    %c0_4 = arith.constant 0 : index
    %c0_5 = arith.constant 0 : index
    %6 = vector.load %arg6[%c0_4, %c0_5] : memref<1x512xf32, #tpu.memory_space<vmem>>, vector<1x512xf32>
    %7 = vector.broadcast %6 : vector<1x512xf32> to vector<16x512xf32>
    %8 = arith.addf %5, %7 : vector<16x512xf32>
    %c0_6 = arith.constant 0 : index
    %c0_7 = arith.constant 0 : index
    %9 = vector.load %arg3[%c0_6, %c0_7] : memref<16x1xi32, #tpu.memory_space<vmem>>, vector<16x1xi32>
    %10 = arith.sitofp %9 : vector<16x1xi32> to vector<16x1xf32>
    %c0_8 = arith.constant 0 : index
    %c0_9 = arith.constant 0 : index
    %11 = vector.load %arg4[%c0_8, %c0_9] : memref<16x1xf32, #tpu.memory_space<vmem>>, vector<16x1xf32>
    %12 = tpu.iota {dimensions = array<i32: 1>} : vector<16x128xi32>
    %13 = arith.sitofp %12 : vector<16x128xi32> to vector<16x128xf32>
    %14 = vector.broadcast %9 : vector<16x1xi32> to vector<16x128xi32>
    %15 = arith.cmpi eq, %12, %14 : vector<16x128xi32>
    %16 = arith.extui %15 : vector<16x128xi1> to vector<16x128xi32>
    %17 = arith.sitofp %16 : vector<16x128xi32> to vector<16x128xf32>
    %18 = vector.extract_strided_slice %8 {offsets = [0, 0], sizes = [16, 128], strides = [1, 1]} : vector<16x512xf32> to vector<16x128xf32>
    %cst_10 = arith.constant dense<0xFF800000> : vector<16xf32>
    %19 = vector.multi_reduction <maximumf>, %18, %cst_10 [1] : vector<16x128xf32> to vector<16xf32>
    %20 = vector.shape_cast %19 : vector<16xf32> to vector<16x1xf32>
    %21 = vector.broadcast %20 : vector<16x1xf32> to vector<16x128xf32>
    %22 = arith.subf %18, %21 : vector<16x128xf32>
    %23 = math.exp %22 : vector<16x128xf32>
    %cst_11 = arith.constant dense<0.000000e+00> : vector<16xf32>
    %24 = vector.multi_reduction <add>, %23, %cst_11 [1] : vector<16x128xf32> to vector<16xf32>
    %25 = vector.shape_cast %24 : vector<16xf32> to vector<16x1xf32>
    %26 = math.log %25 : vector<16x1xf32>
    %27 = arith.mulf %17, %18 : vector<16x128xf32>
    %cst_12 = arith.constant dense<0.000000e+00> : vector<16xf32>
    %28 = vector.multi_reduction <add>, %27, %cst_12 [1] : vector<16x128xf32> to vector<16xf32>
    %29 = vector.shape_cast %28 : vector<16xf32> to vector<16x1xf32>
    %30 = arith.addf %20, %26 : vector<16x1xf32>
    %31 = arith.subf %30, %29 : vector<16x1xf32>
    %32 = vector.broadcast %20 : vector<16x1xf32> to vector<16x128xf32>
    %33 = arith.cmpf oeq, %18, %32 : vector<16x128xf32>
    %cst_13 = arith.constant 1.000000e+09 : f32
    %34 = vector.broadcast %cst_13 : f32 to vector<16x128xf32>
    %35 = arith.select %33, %13, %34 : vector<16x128xi1>, vector<16x128xf32>
    %cst_14 = arith.constant dense<0x7F800000> : vector<16xf32>
    %36 = vector.multi_reduction <minimumf>, %35, %cst_14 [1] : vector<16x128xf32> to vector<16xf32>
    %37 = vector.shape_cast %36 : vector<16xf32> to vector<16x1xf32>
    %38 = arith.cmpf oeq, %37, %10 : vector<16x1xf32>
    %39 = arith.extui %38 : vector<16x1xi1> to vector<16x1xi32>
    %40 = arith.sitofp %39 : vector<16x1xi32> to vector<16x1xf32>
    %41 = arith.mulf %31, %11 : vector<16x1xf32>
    %cst_15 = arith.constant dense<0.000000e+00> : vector<1xf32>
    %42 = vector.multi_reduction <add>, %41, %cst_15 [0] : vector<16x1xf32> to vector<1xf32>
    %43 = vector.shape_cast %42 : vector<1xf32> to vector<1x1xf32>
    %44 = arith.mulf %40, %11 : vector<16x1xf32>
    %cst_16 = arith.constant dense<0.000000e+00> : vector<1xf32>
    %45 = vector.multi_reduction <add>, %44, %cst_16 [0] : vector<16x1xf32> to vector<1xf32>
    %46 = vector.shape_cast %45 : vector<1xf32> to vector<1x1xf32>
    %47 = vector.extract_strided_slice %8 {offsets = [0, 128], sizes = [16, 128], strides = [1, 1]} : vector<16x512xf32> to vector<16x128xf32>
    %cst_17 = arith.constant dense<0xFF800000> : vector<16xf32>
    %48 = vector.multi_reduction <maximumf>, %47, %cst_17 [1] : vector<16x128xf32> to vector<16xf32>
    %49 = vector.shape_cast %48 : vector<16xf32> to vector<16x1xf32>
    %50 = vector.broadcast %49 : vector<16x1xf32> to vector<16x128xf32>
    %51 = arith.subf %47, %50 : vector<16x128xf32>
    %52 = math.exp %51 : vector<16x128xf32>
    %cst_18 = arith.constant dense<0.000000e+00> : vector<16xf32>
    %53 = vector.multi_reduction <add>, %52, %cst_18 [1] : vector<16x128xf32> to vector<16xf32>
    %54 = vector.shape_cast %53 : vector<16xf32> to vector<16x1xf32>
    %55 = math.log %54 : vector<16x1xf32>
    %56 = arith.mulf %17, %47 : vector<16x128xf32>
    %cst_19 = arith.constant dense<0.000000e+00> : vector<16xf32>
    %57 = vector.multi_reduction <add>, %56, %cst_19 [1] : vector<16x128xf32> to vector<16xf32>
    %58 = vector.shape_cast %57 : vector<16xf32> to vector<16x1xf32>
    %59 = arith.addf %49, %55 : vector<16x1xf32>
    %60 = arith.subf %59, %58 : vector<16x1xf32>
    %61 = vector.broadcast %49 : vector<16x1xf32> to vector<16x128xf32>
    %62 = arith.cmpf oeq, %47, %61 : vector<16x128xf32>
    %cst_20 = arith.constant 1.000000e+09 : f32
    %63 = vector.broadcast %cst_20 : f32 to vector<16x128xf32>
    %64 = arith.select %62, %13, %63 : vector<16x128xi1>, vector<16x128xf32>
    %cst_21 = arith.constant dense<0x7F800000> : vector<16xf32>
    %65 = vector.multi_reduction <minimumf>, %64, %cst_21 [1] : vector<16x128xf32> to vector<16xf32>
    %66 = vector.shape_cast %65 : vector<16xf32> to vector<16x1xf32>
    %67 = arith.cmpf oeq, %66, %10 : vector<16x1xf32>
    %68 = arith.extui %67 : vector<16x1xi1> to vector<16x1xi32>
    %69 = arith.sitofp %68 : vector<16x1xi32> to vector<16x1xf32>
    %70 = arith.mulf %60, %11 : vector<16x1xf32>
    %cst_22 = arith.constant dense<0.000000e+00> : vector<1xf32>
    %71 = vector.multi_reduction <add>, %70, %cst_22 [0] : vector<16x1xf32> to vector<1xf32>
    %72 = vector.shape_cast %71 : vector<1xf32> to vector<1x1xf32>
    %73 = arith.mulf %69, %11 : vector<16x1xf32>
    %cst_23 = arith.constant dense<0.000000e+00> : vector<1xf32>
    %74 = vector.multi_reduction <add>, %73, %cst_23 [0] : vector<16x1xf32> to vector<1xf32>
    %75 = vector.shape_cast %74 : vector<1xf32> to vector<1x1xf32>
    %76 = vector.extract_strided_slice %8 {offsets = [0, 256], sizes = [16, 128], strides = [1, 1]} : vector<16x512xf32> to vector<16x128xf32>
    %cst_24 = arith.constant dense<0xFF800000> : vector<16xf32>
    %77 = vector.multi_reduction <maximumf>, %76, %cst_24 [1] : vector<16x128xf32> to vector<16xf32>
    %78 = vector.shape_cast %77 : vector<16xf32> to vector<16x1xf32>
    %79 = vector.broadcast %78 : vector<16x1xf32> to vector<16x128xf32>
    %80 = arith.subf %76, %79 : vector<16x128xf32>
    %81 = math.exp %80 : vector<16x128xf32>
    %cst_25 = arith.constant dense<0.000000e+00> : vector<16xf32>
    %82 = vector.multi_reduction <add>, %81, %cst_25 [1] : vector<16x128xf32> to vector<16xf32>
    %83 = vector.shape_cast %82 : vector<16xf32> to vector<16x1xf32>
    %84 = math.log %83 : vector<16x1xf32>
    %85 = arith.mulf %17, %76 : vector<16x128xf32>
    %cst_26 = arith.constant dense<0.000000e+00> : vector<16xf32>
    %86 = vector.multi_reduction <add>, %85, %cst_26 [1] : vector<16x128xf32> to vector<16xf32>
    %87 = vector.shape_cast %86 : vector<16xf32> to vector<16x1xf32>
    %88 = arith.addf %78, %84 : vector<16x1xf32>
    %89 = arith.subf %88, %87 : vector<16x1xf32>
    %90 = vector.broadcast %78 : vector<16x1xf32> to vector<16x128xf32>
    %91 = arith.cmpf oeq, %76, %90 : vector<16x128xf32>
    %cst_27 = arith.constant 1.000000e+09 : f32
    %92 = vector.broadcast %cst_27 : f32 to vector<16x128xf32>
    %93 = arith.select %91, %13, %92 : vector<16x128xi1>, vector<16x128xf32>
    %cst_28 = arith.constant dense<0x7F800000> : vector<16xf32>
    %94 = vector.multi_reduction <minimumf>, %93, %cst_28 [1] : vector<16x128xf32> to vector<16xf32>
    %95 = vector.shape_cast %94 : vector<16xf32> to vector<16x1xf32>
    %96 = arith.cmpf oeq, %95, %10 : vector<16x1xf32>
    %97 = arith.extui %96 : vector<16x1xi1> to vector<16x1xi32>
    %98 = arith.sitofp %97 : vector<16x1xi32> to vector<16x1xf32>
    %99 = arith.mulf %89, %11 : vector<16x1xf32>
    %cst_29 = arith.constant dense<0.000000e+00> : vector<1xf32>
    %100 = vector.multi_reduction <add>, %99, %cst_29 [0] : vector<16x1xf32> to vector<1xf32>
    %101 = vector.shape_cast %100 : vector<1xf32> to vector<1x1xf32>
    %102 = arith.mulf %98, %11 : vector<16x1xf32>
    %cst_30 = arith.constant dense<0.000000e+00> : vector<1xf32>
    %103 = vector.multi_reduction <add>, %102, %cst_30 [0] : vector<16x1xf32> to vector<1xf32>
    %104 = vector.shape_cast %103 : vector<1xf32> to vector<1x1xf32>
    %105 = vector.extract_strided_slice %8 {offsets = [0, 384], sizes = [16, 128], strides = [1, 1]} : vector<16x512xf32> to vector<16x128xf32>
    %cst_31 = arith.constant dense<0xFF800000> : vector<16xf32>
    %106 = vector.multi_reduction <maximumf>, %105, %cst_31 [1] : vector<16x128xf32> to vector<16xf32>
    %107 = vector.shape_cast %106 : vector<16xf32> to vector<16x1xf32>
    %108 = vector.broadcast %107 : vector<16x1xf32> to vector<16x128xf32>
    %109 = arith.subf %105, %108 : vector<16x128xf32>
    %110 = math.exp %109 : vector<16x128xf32>
    %cst_32 = arith.constant dense<0.000000e+00> : vector<16xf32>
    %111 = vector.multi_reduction <add>, %110, %cst_32 [1] : vector<16x128xf32> to vector<16xf32>
    %112 = vector.shape_cast %111 : vector<16xf32> to vector<16x1xf32>
    %113 = math.log %112 : vector<16x1xf32>
    %114 = arith.mulf %17, %105 : vector<16x128xf32>
    %cst_33 = arith.constant dense<0.000000e+00> : vector<16xf32>
    %115 = vector.multi_reduction <add>, %114, %cst_33 [1] : vector<16x128xf32> to vector<16xf32>
    %116 = vector.shape_cast %115 : vector<16xf32> to vector<16x1xf32>
    %117 = arith.addf %107, %113 : vector<16x1xf32>
    %118 = arith.subf %117, %116 : vector<16x1xf32>
    %119 = vector.broadcast %107 : vector<16x1xf32> to vector<16x128xf32>
    %120 = arith.cmpf oeq, %105, %119 : vector<16x128xf32>
    %cst_34 = arith.constant 1.000000e+09 : f32
    %121 = vector.broadcast %cst_34 : f32 to vector<16x128xf32>
    %122 = arith.select %120, %13, %121 : vector<16x128xi1>, vector<16x128xf32>
    %cst_35 = arith.constant dense<0x7F800000> : vector<16xf32>
    %123 = vector.multi_reduction <minimumf>, %122, %cst_35 [1] : vector<16x128xf32> to vector<16xf32>
    %124 = vector.shape_cast %123 : vector<16xf32> to vector<16x1xf32>
    %125 = arith.cmpf oeq, %124, %10 : vector<16x1xf32>
    %126 = arith.extui %125 : vector<16x1xi1> to vector<16x1xi32>
    %127 = arith.sitofp %126 : vector<16x1xi32> to vector<16x1xf32>
    %128 = arith.mulf %118, %11 : vector<16x1xf32>
    %cst_36 = arith.constant dense<0.000000e+00> : vector<1xf32>
    %129 = vector.multi_reduction <add>, %128, %cst_36 [0] : vector<16x1xf32> to vector<1xf32>
    %130 = vector.shape_cast %129 : vector<1xf32> to vector<1x1xf32>
    %131 = arith.mulf %127, %11 : vector<16x1xf32>
    %cst_37 = arith.constant dense<0.000000e+00> : vector<1xf32>
    %132 = vector.multi_reduction <add>, %131, %cst_37 [0] : vector<16x1xf32> to vector<1xf32>
    %133 = vector.shape_cast %132 : vector<1xf32> to vector<1x1xf32>
    %134 = tpu.concatenate %43, %72, %101, %130 in 1 : vector<1x1xf32>, vector<1x1xf32>, vector<1x1xf32>, vector<1x1xf32> -> vector<1x4xf32>
    %135 = tpu.concatenate %46, %75, %104, %133 in 1 : vector<1x1xf32>, vector<1x1xf32>, vector<1x1xf32>, vector<1x1xf32> -> vector<1x4xf32>
    %c0_38 = arith.constant 0 : index
    %c0_39 = arith.constant 0 : index
    %136 = vector.load %arg7[%c0_38, %c0_39] : memref<8x128xf32, #tpu.memory_space<vmem>>, vector<1x4xf32>
    %137 = arith.addf %136, %134 : vector<1x4xf32>
    %c0_40 = arith.constant 0 : index
    %c0_41 = arith.constant 0 : index
    %138 = vector.load %arg7[%c0_40, %c0_41] : memref<8x128xf32, #tpu.memory_space<vmem>>, vector<1x4xf32>
    tpu.vector_store %arg7[%c0_40, %c0_41], %137 {strides = array<i32>} : memref<8x128xf32, #tpu.memory_space<vmem>>, vector<1x4xf32>,
    %c1 = arith.constant 1 : index
    %c0_42 = arith.constant 0 : index
    %139 = vector.load %arg7[%c1, %c0_42] : memref<8x128xf32, #tpu.memory_space<vmem>>, vector<1x4xf32>
    %140 = arith.addf %139, %135 : vector<1x4xf32>
    %c1_43 = arith.constant 1 : index
    %c0_44 = arith.constant 0 : index
    %141 = vector.load %arg7[%c1_43, %c0_44] : memref<8x128xf32, #tpu.memory_space<vmem>>, vector<1x4xf32>
    tpu.vector_store %arg7[%c1_43, %c0_44], %140 {strides = array<i32>} : memref<8x128xf32, #tpu.memory_space<vmem>>, vector<1x4xf32>,
    return
  }
  func.func @transform_0(%arg0: i32, %arg1: i32) -> (i32, i32) {
    %c1_i32 = arith.constant 1 : i32
    %0 = arith.muli %arg0, %c1_i32 : i32
    %1 = arith.addi %0, %arg1 : i32
    %c0_i32 = arith.constant 0 : i32
    %c0_i32_0 = arith.constant 0 : i32
    return %1, %c0_i32 : i32, i32
  }
  func.func @transform_1(%arg0: i32, %arg1: i32) -> (i32, i32) {
    %c1_i32 = arith.constant 1 : i32
    %0 = arith.muli %arg0, %c1_i32 : i32
    %1 = arith.addi %0, %arg1 : i32
    %c0_i32 = arith.constant 0 : i32
    %c0_i32_0 = arith.constant 0 : i32
    return %1, %c0_i32 : i32, i32
  }
  func.func @transform_2(%arg0: i32, %arg1: i32) -> (i32, i32) {
    %c1_i32 = arith.constant 1 : i32
    %0 = arith.muli %arg0, %c1_i32 : i32
    %1 = arith.addi %0, %arg1 : i32
    %c0_i32 = arith.constant 0 : i32
    %c0_i32_0 = arith.constant 0 : i32
    return %1, %c0_i32 : i32, i32
  }
  func.func @transform_3(%arg0: i32, %arg1: i32) -> (i32, i32) {
    %c0_i32 = arith.constant 0 : i32
    %c0_i32_0 = arith.constant 0 : i32
    %c0_i32_1 = arith.constant 0 : i32
    return %c0_i32, %c0_i32_0 : i32, i32
  }
  func.func @transform_4(%arg0: i32, %arg1: i32) -> (i32, i32) {
    %c0_i32 = arith.constant 0 : i32
    %c0_i32_0 = arith.constant 0 : i32
    %c0_i32_1 = arith.constant 0 : i32
    return %c0_i32, %c0_i32_0 : i32, i32
  }
  func.func @transform_5(%arg0: i32, %arg1: i32) -> (i32, i32) {
    %c0_i32 = arith.constant 0 : i32
    %c0_i32_0 = arith.constant 0 : i32
    return %arg0, %c0_i32 : i32, i32
  }
}

</mosaic_0001>

<bundles_post_ra>
// kernel: tpu_custom_call.1
= control target key start
LH: loop header
LB: loop body
LE: loop exit
PB: predicated region body
PF: predicated region fallthrough
CT: control target
= control target key end

     0   :  { %10 = vsyncpa [#allocation3], 0  ;;  %s1177_s0 = inlined_call_operand.vmem [shape: bf16[16,128], index: 0, kind: input, shape index: {}]   ;;  %s1178_s1 = inlined_call_operand.vmem [shape: s32[16,1], index: 1, kind: input, shape index: {}]   ;;  %s1179_s2 = inlined_call_operand.vmem [shape: f32[16,1], index: 2, kind: input, shape index: {}]   ;;  %s1180_s3 = inlined_call_operand.hbm [shape: bf16[128,512], index: 3, kind: input, shape index: {}]   ;;  %s1181_s4 = inlined_call_operand.vmem [shape: f32[1,512], index: 4, kind: input, shape index: {}]   ;;  %s1182_s5 = inlined_call_operand.hbm [shape: f32[8,128], index: 5, kind: output, shape index: {}]  }
   0x1   :  { %11 = vsyncpa [#allocation4], 0  ;;  %s944_s18 = smov [#allocation2]  }
   0x2   :  { %s47_s19 = sshll.u32 %s944_s18, 4  ;;  %s48_s19 = int_to_ptr.vmem [resolvable:$true] %s47_s19 }
   0x3   :  { %s908_s20 = scalar_lea.vmem %s48_s19, 4096  ;;  %p913_p1 = scmp.lt.s32.totalorder %s48_s19, %s48_s19 }
   0x4   :  { %p909_p0 = scmp.ne.s32.totalorder %s48_s19, %s908_s20  ;;  %p914_p2 = scmp.lt.s32.totalorder %s908_s20, %s908_s20 }
   0x6   :  { %p915_p3 = por %p914_p2, %p913_p1 }
   0x8   :  { %p916_p4 = pnand %p915_p3, %p909_p0 }
   0xa   :  { %919 = shalt.err (!%p916_p4)
}
   0xb   :  { %s945_s21 = smov 256   ;;  %s946_s22 = smov 16  }
   0xc   :  { %53 = dma.hbm_to_vmem [thread:$0]  %s1180_s3, 4096, %s48_s19, [#allocation3], %s945_s21, %s945_s21, %s946_s22  }
   0xd   :  { %940 = dma.done.wait [#allocation3], 4096  }
   0xe   :  { %941 = vsyncadd [#allocation3], 4294963200  ;;  %v947_v0 = vmov 0   ;;  %v819_v1 = vld [vmem:[#allocation2 + $0xe4] ss:$16 sps:$4 sm:$0xff]   ;;  %v143_v34 = vlaneseq  ;;  %v1013_v57 = vld [vmem:[%s1178_s1 + $0x8] sm:$0xff] }
   0xf   :  { %361 = vmatprep.mubr.bf16.mxu0 %v947_v0  ;;  %404 = vmatprep.mubr.bf16.mxu1 %v947_v0  ;;  %v821_v2 = vld [vmem:[#allocation2 + $0xec] ss:$16 sps:$4 sm:$0xff]   ;;  %v823_v3 = vld [vmem:[#allocation2 + $0xe0] ss:$16 sps:$4 sm:$0xff]   ;;  %v824_v4 = vld [vmem:[#allocation2 + $0xe8] ss:$16 sps:$4 sm:$0xff]  }
  0x10   :  { %818 = vset.pattern.permute.xlu1 %v947_v0  ;;  %817 = vset.pattern.permute.xlu0 %v947_v0  ;;  %v825_v5 = vld [vmem:[#allocation2 + $0xc4] ss:$16 sps:$4 sm:$0xff]   ;;  %v827_v6 = vld [vmem:[#allocation2 + $0xcc] ss:$16 sps:$4 sm:$0xff]   ;;  %v829_v7 = vld [vmem:[#allocation2 + $0xc0] ss:$16 sps:$4 sm:$0xff]  }
  0x11   :  { %329 = vmatprep.subr.bf16.mxu0 %v819_v1  ;;  %372 = vmatprep.subr.bf16.mxu1 %v821_v2  ;;  %v830_v8 = vld [vmem:[#allocation2 + $0xc8] ss:$16 sps:$4 sm:$0xff]   ;;  %v831_v9 = vld [vmem:[#allocation2 + $0xa4] ss:$16 sps:$4 sm:$0xff]   ;;  %v833_v10 = vld [vmem:[#allocation2 + $0xac] ss:$16 sps:$4 sm:$0xff]  }
  0x12   :  { %330 = vmatpush1.bf16.msra.mxu0 %v823_v3  ;;  %373 = vmatpush1.bf16.msra.mxu1 %v824_v4  ;;  %v835_v11 = vld [vmem:[#allocation2 + $0xa0] ss:$16 sps:$4 sm:$0xff]   ;;  %v836_v12 = vld [vmem:[#allocation2 + $0xa8] ss:$16 sps:$4 sm:$0xff]   ;;  %v837_v13 = vld [vmem:[#allocation2 + $0x84] ss:$16 sps:$4 sm:$0xff]  }
  0x13   :  { %331 = vmatprep.subr.bf16.mxu0 %v825_v5  ;;  %374 = vmatprep.subr.bf16.mxu1 %v827_v6  ;;  %v839_v14 = vld [vmem:[#allocation2 + $0x8c] ss:$16 sps:$4 sm:$0xff]   ;;  %v841_v15 = vld [vmem:[#allocation2 + $0x80] ss:$16 sps:$4 sm:$0xff]   ;;  %v842_v16 = vld [vmem:[#allocation2 + $0x88] ss:$16 sps:$4 sm:$0xff]  }
  0x14   :  { %v843_v17 = vld [vmem:[#allocation2 + $0x64] ss:$16 sps:$4 sm:$0xff]   ;;  %v845_v18 = vld [vmem:[#allocation2 + $0x6c] ss:$16 sps:$4 sm:$0xff]   ;;  %v847_v19 = vld [vmem:[#allocation2 + $0x60] ss:$16 sps:$4 sm:$0xff]  }
  0x15   :  { %v848_v20 = vld [vmem:[#allocation2 + $0x68] ss:$16 sps:$4 sm:$0xff]   ;;  %v849_v21 = vld [vmem:[#allocation2 + $0x44] ss:$16 sps:$4 sm:$0xff]   ;;  %v851_v22 = vld [vmem:[#allocation2 + $0x4c] ss:$16 sps:$4 sm:$0xff]  }
  0x16   :  { %332 = vmatpush1.bf16.msra.mxu0 %v829_v7  ;;  %375 = vmatpush1.bf16.msra.mxu1 %v830_v8  ;;  %v853_v23 = vld [vmem:[#allocation2 + $0x40] ss:$16 sps:$4 sm:$0xff]   ;;  %v854_v24 = vld [vmem:[#allocation2 + $0x48] ss:$16 sps:$4 sm:$0xff]   ;;  %v855_v25 = vld [vmem:[#allocation2 + $0x24] ss:$16 sps:$4 sm:$0xff]  }
  0x17   :  { %333 = vmatprep.subr.bf16.mxu0 %v831_v9  ;;  %376 = vmatprep.subr.bf16.mxu1 %v833_v10  ;;  %v857_v26 = vld [vmem:[#allocation2 + $0x2c] ss:$16 sps:$4 sm:$0xff]   ;;  %v859_v27 = vld [vmem:[#allocation2 + $0x20] ss:$16 sps:$4 sm:$0xff]   ;;  %v860_v28 = vld [vmem:[#allocation2 + $0x28] ss:$16 sps:$4 sm:$0xff]  }
  0x18   :  { %v861_v29 = vld [vmem:[#allocation2 + $0x4] ss:$16 sps:$4 sm:$0xff]   ;;  %v863_v30 = vld [vmem:[#allocation2 + $0xc] ss:$16 sps:$4 sm:$0xff]   ;;  %v865_v31 = vld [vmem:[#allocation2] ss:$16 sps:$4 sm:$0xff]  }
  0x19   :  { %v866_v32 = vld [vmem:[#allocation2 + $0x8] ss:$16 sps:$4 sm:$0xff]   ;;  %v867_v33 = vld [vmem:[%s1177_s0] sm:$0xff]   ;;  %v144_v35 = vshrl.u32 %v143_v34, 7  ;;  %v948_v58 = vmov 0.0   ;;  %vm480_vm11 = vcmask 7168  }
  0x1a   :  { %334 = vmatpush1.bf16.msra.mxu0 %v835_v11  ;;  %377 = vmatpush1.bf16.msra.mxu1 %v836_v12  ;;  %v141_v37 = vld [vmem:[%s1181_s4] sm:$0xf]  ;;  %106 = vst [vmem:[#allocation5] sm:$0xff] %v948_v58  ;;  %v422_v12 = vand.u32 127, %v143_v34  ;;  %s950_s8 = smov 2   ;;  %s951_s9 = smov 3  }
  0x1b   :  { %335 = vmatprep.subr.bf16.mxu0 %v837_v13  ;;  %378 = vmatprep.subr.bf16.mxu1 %v839_v14  ;;  %v153_v36 = vsub.s32 2, %v144_v35  ;;  %v149_v38 = vsub.s32 1, %v144_v35  ;;  %v157_v41 = vsub.s32 3, %v144_v35  ;;  %v1020_v59 = vld [vmem:[%s1178_s1] sm:$0xff]  ;;  %v145_v60 = vsub.s32 0, %v144_v35  ;;  %s952_s10 = smov [#allocation5]  }
  0x1c   :  { %s738_s11 = sshll.u32 %s952_s10, 4  ;;  %s739_s11 = int_to_ptr.vmem [resolvable:$true] %s738_s11 }
  0x1d   :  { %v154_v39 = vrot.slane %v141_v37, %v153_v36  ;;  %v150_v40 = vrot.slane %v141_v37, %v149_v38  ;;  %v158_v48 = vrot.slane %v141_v37, %v157_v41  ;;  %v146_v61 = vrot.slane %v141_v37, %v145_v60  ;;  %s920_s12 = scalar_lea.vmem %s739_s11, 128  ;;  %p925_p6 = scmp.lt.s32.totalorder %s739_s11, %s739_s11 }
  0x1e   :  { %336 = vmatpush1.bf16.msra.mxu0 %v841_v15  ;;  %379 = vmatpush1.bf16.msra.mxu1 %v842_v16  ;;  %p921_p5 = scmp.ne.s32.totalorder %s739_s11, %s920_s12  ;;  %p926_p7 = scmp.lt.s32.totalorder %s920_s12, %s920_s12 }
  0x1f   :  { %337 = vmatprep.subr.bf16.mxu0 %v843_v17  ;;  %380 = vmatprep.subr.bf16.mxu1 %v845_v18 }
  0x20   :  { %p927_p8 = por %p926_p7, %p925_p6 }
  0x22   :  { %338 = vmatpush1.bf16.msra.mxu0 %v847_v19  ;;  %381 = vmatpush1.bf16.msra.mxu1 %v848_v20  ;;  %p928_p9 = pnand %p927_p8, %p921_p5 }
  0x23   :  { %339 = vmatprep.subr.bf16.mxu0 %v849_v21  ;;  %382 = vmatprep.subr.bf16.mxu1 %v851_v22 }
  0x26   :  { %340 = vmatpush1.bf16.msra.mxu0 %v853_v23  ;;  %383 = vmatpush1.bf16.msra.mxu1 %v854_v24 }
  0x27   :  { %341 = vmatprep.subr.bf16.mxu0 %v855_v25  ;;  %384 = vmatprep.subr.bf16.mxu1 %v857_v26 }
  0x2a   :  { %342 = vmatpush1.bf16.msra.mxu0 %v859_v27  ;;  %385 = vmatpush1.bf16.msra.mxu1 %v860_v28  ;;  %v423_v27 = vcvt.s32.f32 %v422_v12 }
  0x2b   :  { %343 = vmatprep.subr.bf16.mxu0 %v861_v29  ;;  %386 = vmatprep.subr.bf16.mxu1 %v863_v30 }
  0x2e   :  { %344 = vmatpush1.bf16.msra.mxu0 %v865_v31  ;;  %387 = vmatpush1.bf16.msra.mxu1 %v866_v32 }
  0x31   :  { %362 = vmatmul.mubr.bf16.vlgmr.msra.gmra.mxu0 %v867_v33  ;;  %405 = vmatmul.mubr.bf16.vlgmr.msra.gmra.mxu1 %v867_v33 }
  0xf1   :  { %v363_v42 = vpop.f32.mrf.mxu0  ;;  %v406_v43 = vpop.f32.mrf.mxu1 }
  0xf2   :  { %v992_v44 = vadd.f32 %v406_v43, %v154_v39  ;;  %v1023_v62 = vadd.f32 %v363_v42, %v146_v61 }
  0xf3   :  { %v365_v45 = vpop.f32.mrf.mxu0  ;;  %v408_v46 = vpop.f32.mrf.mxu1 }
  0xf4   :  { %v994_v47 = vadd.f32 %v365_v45, %v150_v40  ;;  %565 = vmax.xlane.f32.xlu1 %v992_v44  ;;  %v1000_v53 = vadd.f32 %v408_v46, %v158_v48 }
  0xf5   :  { %v367_v49 = vpop.f32.mrf.mxu0  ;;  %v410_v50 = vpop.f32.mrf.mxu1 }
  0xf6   :  { %v997_v51 = vadd.f32 %v410_v50, %v154_v39  ;;  %501 = vmax.xlane.f32.xlu0 %v994_v47  ;;  %v1025_v63 = vadd.f32 %v367_v49, %v146_v61 }
  0xf7   :  { %v412_v52 = vpop.f32.mrf.mxu1  ;;  %v369_v54 = vpop.f32.mrf.mxu0 }
  0xf8   :  { %567 = vmax.xlane.f32.xlu1 %v997_v51  ;;  %v1003_v55 = vadd.f32 %v412_v52, %v158_v48  ;;  %v1006_v56 = vadd.f32 %v369_v54, %v150_v40 }
  0xfa   :  { %629 = vmax.xlane.f32.xlu0 %v1000_v53 }
  0xfc   :  { %631 = vmax.xlane.f32.xlu1 %v1003_v55 }
  0xfe   :  { %503 = vmax.xlane.f32.xlu0 %v1006_v56 }
 0x10d   :  { %428 = vperm.xlu1 %818, %v1013_v57  }
 0x114   :  { %425 = vperm.xlu0 %817, %v1020_v59  }
 0x131   :  { %436 = vmax.xlane.f32.xlu1 %v1023_v62 }
 0x133   :  { %438 = vmax.xlane.f32.xlu0 %v1025_v63 }
 0x17d   :  { %v1029_v0 = vpop.xlane.xlu1 %565 }
 0x17e   :  { %v569_v1 = vsub.f32 %v992_v44, %v1029_v0  ;;  %vm593_vm3 = vcmp.eq.f32.partialorder %v992_v44, %v1029_v0 }
 0x17f   :  { %v1033_v2 = vpop.xlane.xlu0 %501  ;;  %v595_v32 = vsel %vm593_vm3, %v423_v27, 1e+09  ;;  %vm708_vm3 = vcmask 23552  }
 0x180   :  { %v571_v3 = vmul.f32 1.442695, %v569_v1  ;;  %v505_v4 = vsub.f32 %v994_v47, %v1033_v2  ;;  %vm529_vm2 = vcmp.eq.f32.partialorder %v994_v47, %v1033_v2 }
 0x181   :  { %v1037_v5 = vpop.xlane.xlu1 %567  ;;  %v531_v28 = vsel %vm529_vm2, %v423_v27, 1e+09 }
 0x182   :  { %868 = vpow2.f32 %v571_v3  ;;  %v507_v7 = vmul.f32 1.442695, %v505_v4  ;;  %v570_v10 = vsub.f32 %v997_v51, %v1037_v5  ;;  %vm594_vm6 = vcmp.eq.f32.partialorder %v997_v51, %v1037_v5 }
 0x183   :  { %v1039_v6 = vpop.xlane.xlu0 %629  ;;  %v596_v39 = vsel %vm594_vm6, %v423_v27, 1e+09 }
 0x184   :  { %v633_v8 = vsub.f32 %v1000_v53, %v1039_v6  ;;  %870 = vpow2.f32 %v507_v7  ;;  %v573_v16 = vmul.f32 1.442695, %v570_v10  ;;  %vm657_vm4 = vcmp.eq.f32.partialorder %v1000_v53, %v1039_v6 }
 0x185   :  { %v1043_v9 = vpop.xlane.xlu1 %631  ;;  %v659_v36 = vsel %vm657_vm4, %v423_v27, 1e+09  ;;  %vm706_vm4 = vcmask 15360  }
 0x186   :  { %v635_v11 = vmul.f32 1.442695, %v633_v8  ;;  %v634_v20 = vsub.f32 %v1003_v55, %v1043_v9  ;;  %vm658_vm7 = vcmp.eq.f32.partialorder %v1003_v55, %v1043_v9 }
 0x187   :  { %v1047_v13 = vpop.xlane.xlu0 %503  ;;  %v660_v41 = vsel %vm658_vm7, %v423_v27, 1e+09 }
 0x188   :  { %872 = vpow2.f32 %v635_v11  ;;  %v506_v17 = vsub.f32 %v1006_v56, %v1047_v13  ;;  %v637_v25 = vmul.f32 1.442695, %v634_v20  ;;  %vm530_vm5 = vcmp.eq.f32.partialorder %v1006_v56, %v1047_v13  ;;  %v1112_v20 = vld [vmem:[%s1179_s2 + $0x8] sm:$0xff] }
 0x189   :  { %v429_v14 = vpop.permute.xlu1 %428  ;;  %874 = vpow2.f32 %v573_v16  ;;  %v532_v37 = vsel %vm530_vm5, %v423_v27, 1e+09  ;;  %v1106_v16 = vld [vmem:[%s1179_s2] sm:$0xff]  ;;  %s949_s2 = smov 1   ;;  %vm727_vm5 = vcmask 24576  }
 0x18a   :  { %vm431_vm0 = vcmp.eq.s32.totalorder %v422_v12, %v429_v14  ;;  %v509_v21 = vmul.f32 1.442695, %v506_v17 }
 0x18b   :  { %v1050_v15 = vsel %vm431_vm0, 1.0, %v948_v58 }
 0x18c   :  { %v520_v18 = vmul.f32 %v1050_v15, %v1006_v56  ;;  %876 = vpow2.f32 %v509_v21  ;;  %v584_v38 = vmul.f32 %v1050_v15, %v997_v51  ;;  %v648_v40 = vmul.f32 %v1050_v15, %v1003_v55 }
 0x18d   :  { %878 = vpow2.f32 %v637_v25  ;;  %v455_v51 = vmul.f32 %v1050_v15, %v1025_v63  ;;  %v1101_v15 = vcvt.s32.f32 %v1013_v57 }
 0x18e   :  { %523 = vadd.xlane.f32.xlu1 %v520_v18 }
 0x18f   :  { %v426_v19 = vpop.permute.xlu0 %425  ;;  %v869_v22 = vpop.eup %868 }
 0x190   :  { %vm430_vm1 = vcmp.eq.s32.totalorder %v422_v12, %v426_v19 }
 0x191   :  { %v798_v23 = vsel %vm430_vm1, 1.0, %v948_v58  ;;  %v871_v26 = vpop.eup %870 }
 0x192   :  { %575 = vadd.xlane.f32.xlu1 %v869_v22  ;;  %v519_v24 = vmul.f32 %v798_v23, %v994_v47  ;;  %v583_v30 = vmul.f32 %v798_v23, %v992_v44  ;;  %v647_v34 = vmul.f32 %v798_v23, %v1000_v53  ;;  %v454_v50 = vmul.f32 %v798_v23, %v1023_v62 }
 0x194   :  { %521 = vadd.xlane.f32.xlu0 %v519_v24 }
 0x195   :  { %v873_v29 = vpop.eup %872 }
 0x196   :  { %511 = vadd.xlane.f32.xlu1 %v871_v26  ;;  %v875_v31 = vpop.eup %874 }
 0x198   :  { %533 = vmin.xlane.f32.xlu0 %v531_v28 }
 0x199   :  { %v877_v33 = vpop.eup %876 }
 0x19a   :  { %639 = vadd.xlane.f32.xlu1 %v873_v29  ;;  %v879_v35 = vpop.eup %878 }
 0x19c   :  { %585 = vadd.xlane.f32.xlu0 %v583_v30 }
 0x19e   :  { %577 = vadd.xlane.f32.xlu1 %v875_v31 }
 0x1a0   :  { %597 = vmin.xlane.f32.xlu0 %v595_v32 }
 0x1a2   :  { %513 = vadd.xlane.f32.xlu1 %v877_v33 }
 0x1a4   :  { %649 = vadd.xlane.f32.xlu0 %v647_v34 }
 0x1a6   :  { %641 = vadd.xlane.f32.xlu1 %v879_v35 }
 0x1a8   :  { %661 = vmin.xlane.f32.xlu0 %v659_v36 }
 0x1aa   :  { %535 = vmin.xlane.f32.xlu1 %v532_v37 }
 0x1ae   :  { %587 = vadd.xlane.f32.xlu1 %v584_v38 }
 0x1b2   :  { %599 = vmin.xlane.f32.xlu1 %v596_v39 }
 0x1b6   :  { %651 = vadd.xlane.f32.xlu1 %v648_v40 }
 0x1ba   :  { %663 = vmin.xlane.f32.xlu1 %v660_v41  ;;  %v1078_v42 = vpop.xlane.xlu1 %436 }
 0x1bb   :  { %v440_v43 = vsub.f32 %v1023_v62, %v1078_v42  ;;  %vm464_vm8 = vcmp.eq.f32.partialorder %v1023_v62, %v1078_v42 }
 0x1bc   :  { %v1082_v44 = vpop.xlane.xlu0 %438  ;;  %v466_v52 = vsel %vm464_vm8, %v423_v27, 1e+09 }
 0x1bd   :  { %v442_v45 = vmul.f32 1.442695, %v440_v43  ;;  %v441_v46 = vsub.f32 %v1025_v63, %v1082_v44  ;;  %vm465_vm9 = vcmp.eq.f32.partialorder %v1025_v63, %v1082_v44  ;;  %v1096_v63 = vcvt.s32.f32 %v1020_v59 }
 0x1be   :  { %v467_v53 = vsel %vm465_vm9, %v423_v27, 1e+09 }
 0x1bf   :  { %880 = vpow2.f32 %v442_v45  ;;  %v444_v47 = vmul.f32 1.442695, %v441_v46 }
 0x1c1   :  { %882 = vpow2.f32 %v444_v47 }
 0x1cc   :  { %v881_v48 = vpop.eup %880 }
 0x1cd   :  { %446 = vadd.xlane.f32.xlu0 %v881_v48 }
 0x1ce   :  { %v883_v49 = vpop.eup %882 }
 0x1cf   :  { %448 = vadd.xlane.f32.xlu1 %v883_v49 }
 0x1d1   :  { %456 = vadd.xlane.f32.xlu0 %v454_v50 }
 0x1d3   :  { %458 = vadd.xlane.f32.xlu1 %v455_v51 }
 0x1d5   :  { %468 = vmin.xlane.f32.xlu0 %v466_v52 }
 0x1d7   :  { %470 = vmin.xlane.f32.xlu1 %v467_v53 }
 0x217   :  { %v1093_v54 = vpop.xlane.xlu1 %523 }
 0x21b   :  { %v576_v55 = vpop.xlane.xlu1 %575 }
 0x21c   :  { %884 = vlog2.f32 %v576_v55 }
 0x21d   :  { %v522_v56 = vpop.xlane.xlu0 %521 }
 0x21f   :  { %v512_v60 = vpop.xlane.xlu1 %511 }
 0x220   :  { %886 = vlog2.f32 %v512_v60 }
 0x221   :  { %v534_v61 = vpop.xlane.xlu0 %533 }
 0x222   :  { %vm537_vm10 = vcmp.eq.f32.partialorder %v534_v61, %v1096_v63 }
 0x223   :  { %v640_v1 = vpop.xlane.xlu1 %639  ;;  %v802_v17 = vsel %vm537_vm10, 1.0, %v948_v58 }
 0x224   :  { %888 = vlog2.f32 %v640_v1  ;;  %v554_v57 = vmul.f32 %v802_v17, %v1106_v16 }
 0x225   :  { %v586_v3 = vpop.xlane.xlu0 %585 }
 0x226   :  { %v556_v30 = vsel %vm480_vm11, %v554_v57, 0.0 }
 0x227   :  { %v578_v62 = vpop.xlane.xlu1 %577 }
 0x228   :  { %890 = vlog2.f32 %v578_v62 }
 0x229   :  { %v885_v4 = vpop.eup %884  ;;  %v598_v10 = vpop.xlane.xlu0 %597 }
 0x22a   :  { %v580_v7 = vmul.f32 0.6931472, %v885_v4  ;;  %vm601_vm13 = vcmp.eq.f32.partialorder %v598_v10, %v1096_v63 }
 0x22b   :  { %v514_v8 = vpop.xlane.xlu1 %513  ;;  %v804_v31 = vsel %vm601_vm13, 1.0, %v948_v58 }
 0x22c   :  { %892 = vlog2.f32 %v514_v8  ;;  %v589_v12 = vadd.f32 %v580_v7, %v1029_v0  ;;  %v618_v41 = vmul.f32 %v804_v31, %v1106_v16 }
 0x22d   :  { %v887_v11 = vpop.eup %886  ;;  %v650_v0 = vpop.xlane.xlu0 %649 }
 0x22e   :  { %v516_v59 = vmul.f32 0.6931472, %v887_v11  ;;  %v591_v19 = vsub.f32 %v589_v12, %v586_v3  ;;  %v620_v61 = vsel %vm480_vm11, %v618_v41, 0.0 }
 0x22f   :  { %v642_v14 = vpop.xlane.xlu1 %641 }
 0x230   :  { %894 = vlog2.f32 %v642_v14  ;;  %v525_v23 = vadd.f32 %v516_v59, %v1033_v2  ;;  %v607_v28 = vmul.f32 %v591_v19, %v1106_v16 }
 0x231   :  { %v889_v18 = vpop.eup %888  ;;  %v662_v36 = vpop.xlane.xlu0 %661 }
 0x232   :  { %v644_v24 = vmul.f32 0.6931472, %v889_v18  ;;  %v527_v34 = vsub.f32 %v525_v23, %v522_v56  ;;  %v609_v40 = vsel %vm480_vm11, %v607_v28, 0.0  ;;  %vm665_vm14 = vcmp.eq.f32.partialorder %v662_v36, %v1096_v63 }
 0x233   :  { %v536_v21 = vpop.xlane.xlu1 %535 }
 0x234   :  { %vm538_vm12 = vcmp.eq.f32.partialorder %v536_v21, %v1101_v15  ;;  %v653_v35 = vadd.f32 %v644_v24, %v1039_v6  ;;  %v543_v6 = vmul.f32 %v527_v34, %v1106_v16 }
 0x235   :  { %v891_v22 = vpop.eup %890  ;;  %v803_v25 = vsel %vm538_vm12, 1.0, %v948_v58 }
 0x236   :  { %v582_v26 = vmul.f32 0.6931472, %v891_v22  ;;  %v555_v27 = vmul.f32 %v803_v25, %v1112_v20  ;;  %v655_v48 = vsub.f32 %v653_v35, %v650_v0  ;;  %v545_v12 = vsel %vm480_vm11, %v543_v6, 0.0 }
 0x237   :  { %v588_v29 = vpop.xlane.xlu1 %587 }
 0x238   :  { %v557_v32 = vsel %vm480_vm11, %v555_v27, 0.0  ;;  %v590_v33 = vadd.f32 %v582_v26, %v1037_v5  ;;  %v671_v10 = vmul.f32 %v655_v48, %v1106_v16 }
 0x239   :  { %v893_v2 = vpop.eup %892  ;;  %v558_v37 = vadd.f32 %v557_v32, %v556_v30 }
 0x23a   :  { %v518_v38 = vmul.f32 0.6931472, %v893_v2  ;;  %v592_v39 = vsub.f32 %v590_v33, %v588_v29  ;;  %v673_v25 = vsel %vm480_vm11, %v671_v10, 0.0 }
 0x23b   :  { %v559_v43 = vrot.slane %v558_v37, 4  ;;  %v600_v45 = vpop.xlane.xlu1 %599 }
 0x23c   :  { %v526_v46 = vadd.f32 %v518_v38, %v1047_v13  ;;  %v608_v5 = vmul.f32 %v592_v39, %v1112_v20  ;;  %vm602_vm15 = vcmp.eq.f32.partialorder %v600_v45, %v1101_v15 }
 0x23d   :  { %v895_v47 = vpop.eup %894  ;;  %v560_v49 = vadd.f32 %v559_v43, %v558_v37  ;;  %v805_v50 = vsel %vm602_vm15, 1.0, %v948_v58 }
 0x23e   :  { %v528_v51 = vsub.f32 %v526_v46, %v1093_v54  ;;  %v646_v52 = vmul.f32 0.6931472, %v895_v47  ;;  %v610_v53 = vsel %vm480_vm11, %v608_v5, 0.0  ;;  %v619_v13 = vmul.f32 %v805_v50, %v1112_v20 }
 0x23f   :  { %v611_v55 = vadd.f32 %v610_v53, %v609_v40  ;;  %v652_v56 = vpop.xlane.xlu1 %651  ;;  %v561_v60 = vrot.slane %v560_v49, 2  ;;  %v806_v54 = vsel %vm665_vm14, 1.0, %v948_v58 }
 0x240   :  { %v544_v1 = vmul.f32 %v528_v51, %v1112_v20  ;;  %v621_v3 = vsel %vm480_vm11, %v619_v13, 0.0  ;;  %v654_v62 = vadd.f32 %v646_v52, %v1043_v9  ;;  %v682_v9 = vmul.f32 %v806_v54, %v1106_v16 }
 0x241   :  { %v612_v4 = vrot.slane %v611_v55, 4  ;;  %v622_v7 = vadd.f32 %v621_v3, %v620_v61  ;;  %v562_v8 = vadd.f32 %v561_v60, %v560_v49 }
 0x242   :  { %v656_v11 = vsub.f32 %v654_v62, %v652_v56  ;;  %v546_v14 = vsel %vm480_vm11, %v544_v1, 0.0  ;;  %v684_v32 = vsel %vm480_vm11, %v682_v9, 0.0 }
 0x243   :  { %v613_v59 = vadd.f32 %v612_v4, %v611_v55  ;;  %v623_v17 = vrot.slane %v622_v7, 4  ;;  %v664_v18 = vpop.xlane.xlu1 %663  ;;  %v563_v19 = vrot.slane %v562_v8, 1  ;;  %v547_v0 = vadd.f32 %v546_v14, %v545_v12 }
 0x244   :  { %v672_v21 = vmul.f32 %v656_v11, %v1112_v20  ;;  %vm666_vm0 = vcmp.eq.f32.partialorder %v664_v18, %v1101_v15 }
 0x245   :  { %v624_v57 = vadd.f32 %v623_v17, %v622_v7  ;;  %v807_v22 = vsel %vm666_vm0, 1.0, %v948_v58  ;;  %v564_v23 = vadd.f32 %v563_v19, %v562_v8  ;;  %v614_v24 = vrot.slane %v613_v59, 2 }
 0x246   :  { %v674_v26 = vsel %vm480_vm11, %v672_v21, 0.0  ;;  %v683_v27 = vmul.f32 %v807_v22, %v1112_v20  ;;  %v548_v28 = vrot.slane %v547_v0, 4 }
 0x247   :  { %v675_v29 = vadd.f32 %v674_v26, %v673_v25  ;;  %711 = vrot.lane.b32.xlu1 %v564_v23, %s949_s2  ;;  %v615_v30 = vadd.f32 %v614_v24, %v613_v59  ;;  %v625_v31 = vrot.slane %v624_v57, 2 }
 0x248   :  { %v685_v33 = vsel %vm480_vm11, %v683_v27, 0.0  ;;  %v549_v2 = vadd.f32 %v548_v28, %v547_v0 }
 0x249   :  { %v676_v34 = vrot.slane %v675_v29, 4  ;;  %v686_v35 = vadd.f32 %v685_v33, %v684_v32  ;;  %v616_v36 = vrot.slane %v615_v30, 1  ;;  %v626_v37 = vadd.f32 %v625_v31, %v624_v57 }
 0x24a   :  { %v550_v38 = vrot.slane %v549_v2, 2 }
 0x24b   :  { %v677_v39 = vadd.f32 %v676_v34, %v675_v29  ;;  %v687_v40 = vrot.slane %v686_v35, 4  ;;  %v617_v41 = vadd.f32 %v616_v36, %v615_v30  ;;  %v627_v43 = vrot.slane %v626_v37, 1 }
 0x24c   :  { %v551_v45 = vadd.f32 %v550_v38, %v549_v2 }
 0x24d   :  { %v688_v46 = vadd.f32 %v687_v40, %v686_v35  ;;  %698 = vrot.lane.b32.xlu1 %v617_v41, %s950_s8  ;;  %v628_v5 = vadd.f32 %v627_v43, %v626_v37  ;;  %v678_v47 = vrot.slane %v677_v39, 2  ;;  %v725_v35 = vld [vmem:[#allocation5] sm:$0x1]  ;;  %v729_v40 = vld [vmem:[#allocation5 + $0x1] sm:$0x1] }
 0x24e   :  { %v552_v6 = vrot.slane %v551_v45, 1 }
 0x24f   :  { %715 = vrot.lane.b32.xlu0 %v628_v5, %s950_s8  ;;  %v679_v48 = vadd.f32 %v678_v47, %v677_v39  ;;  %v689_v49 = vrot.slane %v688_v46, 2 }
 0x250   :  { %v553_v50 = vadd.f32 %v552_v6, %v551_v45 }
 0x251   :  { %v680_v51 = vrot.slane %v679_v48, 1  ;;  %v690_v52 = vadd.f32 %v689_v49, %v688_v46 }
 0x253   :  { %694 = vrot.lane.b32.xlu0 %v553_v50, %s949_s2  ;;  %v681_v53 = vadd.f32 %v680_v51, %v679_v48  ;;  %v691_v13 = vrot.slane %v690_v52, 1 }
 0x255   :  { %702 = vrot.lane.b32.xlu1 %v681_v53, %s951_s9  ;;  %v692_v55 = vadd.f32 %v691_v13, %v690_v52 }
 0x256   :  { %v447_v56 = vpop.xlane.xlu0 %446 }
 0x257   :  { %719 = vrot.lane.b32.xlu0 %v692_v55, %s951_s9 }
 0x258   :  { %v449_v60 = vpop.xlane.xlu1 %448 }
 0x259   :  { %896 = vlog2.f32 %v449_v60 }
 0x25a   :  { %v457_v61 = vpop.xlane.xlu0 %456  ;;  %898 = vlog2.f32 %v447_v56 }
 0x25c   :  { %v459_v1 = vpop.xlane.xlu1 %458 }
 0x25e   :  { %v469_v3 = vpop.xlane.xlu0 %468 }
 0x25f   :  { %vm472_vm1 = vcmp.eq.f32.partialorder %v469_v3, %v1096_v63 }
 0x260   :  { %v800_v62 = vsel %vm472_vm1, 1.0, %v948_v58  ;;  %v471_v54 = vpop.xlane.xlu1 %470 }
 0x261   :  { %v490_v4 = vmul.f32 %v800_v62, %v1106_v16  ;;  %vm473_vm2 = vcmp.eq.f32.partialorder %v471_v54, %v1101_v15 }
 0x262   :  { %v801_v7 = vsel %vm473_vm2, 1.0, %v948_v58 }
 0x263   :  { %v491_v8 = vmul.f32 %v801_v7, %v1112_v20  ;;  %v492_v10 = vsel %vm480_vm11, %v490_v4, 0.0 }
 0x265   :  { %v493_v11 = vsel %vm480_vm11, %v491_v8, 0.0 }
 0x266   :  { %v494_v12 = vadd.f32 %v493_v11, %v492_v10  ;;  %v897_v14 = vpop.eup %896 }
 0x267   :  { %v899_v63 = vpop.eup %898  ;;  %v453_v59 = vmul.f32 0.6931472, %v897_v14 }
 0x268   :  { %v451_v17 = vmul.f32 0.6931472, %v899_v63  ;;  %v495_v24 = vrot.slane %v494_v12, 4 }
 0x269   :  { %v461_v18 = vadd.f32 %v453_v59, %v1082_v44 }
 0x26a   :  { %v460_v19 = vadd.f32 %v451_v17, %v1078_v42  ;;  %v496_v26 = vadd.f32 %v495_v24, %v494_v12 }
 0x26b   :  { %v463_v15 = vsub.f32 %v461_v18, %v459_v1 }
 0x26c   :  { %v462_v0 = vsub.f32 %v460_v19, %v457_v61  ;;  %v497_v28 = vrot.slane %v496_v26, 2 }
 0x26d   :  { %v479_v58 = vmul.f32 %v463_v15, %v1112_v20 }
 0x26e   :  { %v478_v9 = vmul.f32 %v462_v0, %v1106_v16  ;;  %v498_v29 = vadd.f32 %v497_v28, %v496_v26 }
 0x26f   :  { %v482_v21 = vsel %vm480_vm11, %v479_v58, 0.0 }
 0x270   :  { %v481_v57 = vsel %vm480_vm11, %v478_v9, 0.0  ;;  %v499_v32 = vrot.slane %v498_v29, 1 }
 0x271   :  { %v483_v22 = vadd.f32 %v482_v21, %v481_v57 }
 0x272   :  { %v500_v2 = vadd.f32 %v499_v32, %v498_v29 }
 0x273   :  { %v484_v23 = vrot.slane %v483_v22, 4 }
 0x275   :  { %v485_v25 = vadd.f32 %v484_v23, %v483_v22 }
 0x277   :  { %v486_v27 = vrot.slane %v485_v25, 2 }
 0x279   :  { %v487_v44 = vadd.f32 %v486_v27, %v485_v25 }
 0x27b   :  { %v488_v30 = vrot.slane %v487_v44, 1 }
 0x27d   :  { %v489_v33 = vadd.f32 %v488_v30, %v487_v44 }
 0x2b9   :  { %v712_v42 = vpop.permute.xlu1 %711 }
 0x2ba   :  { %v722_v38 = vsel %vm480_vm11, %v500_v2, %v712_v42 }
 0x2bf   :  { %v699_v20 = vpop.permute.xlu1 %698 }
 0x2c1   :  { %v716_v31 = vpop.permute.xlu0 %715 }
 0x2c2   :  { %v723_v41 = vsel %vm706_vm4, %v722_v38, %v716_v31 }
 0x2c5   :  { %v695_v16 = vpop.permute.xlu0 %694 }
 0x2c6   :  { %v705_v34 = vsel %vm480_vm11, %v489_v33, %v695_v16 }
 0x2c7   :  { %v703_v36 = vpop.permute.xlu1 %702  ;;  %v707_v37 = vsel %vm706_vm4, %v705_v34, %v699_v20 }
 0x2c8   :  { %v709_v39 = vsel %vm708_vm3, %v707_v37, %v703_v36 }
 0x2c9   :  { %v726_v43 = vadd.f32 %v725_v35, %v709_v39  ;;  %v720_v45 = vpop.permute.xlu0 %719 }
 0x2ca   :  { %v724_v46 = vsel %vm708_vm3, %v723_v41, %v720_v45 }
 0x2cb   :  { %v730_v5 = vadd.f32 %v729_v40, %v724_v46  ;;  %728 = vst.msk [vmem:[#allocation5] sm:$0x1] %vm727_vm5, %v726_v43 }
 0x2cd   :  { %731 = vst.msk [vmem:[#allocation5 + $0x1] sm:$0x1] %vm727_vm5, %v730_v5 }
 0x2ce   :  { %931 = shalt.err (!%p928_p9)
}
 0x2cf   :  { %741 = dma.vmem_to_hbm [thread:$0]  %s739_s11, 128, %s1182_s5, [#allocation4]  }
 0x2d0   :  { %942 = dma.done.wait [#allocation4], 128  }
 0x2d1   :  { %943 = vsyncadd [#allocation4], 4294967168 }
 0x2d2   :  { %745 = vsyncpa [#allocation3], 1 }
 0x2d3   :  { %746 = vsyncpa [#allocation4], 1 }

</bundles_post_ra>
